<compile_context>
chip_gen: v5e
topology: v5e:2x2
jax: 0.10.0
libtpu: 0.0.40
codegen_flags: <defaults>
</compile_context>

<pallas_src>
import jax
import jax.numpy as jnp
from jax.experimental import pallas as pl
from jax.experimental.pallas import tpu as pltpu


# ---------------------------------------------------------------------------
# Host-side glue: bilinear interpolation matrices (align_corners=False,
# antialias off), matching torch.nn.functional.interpolate / transforms.Resize
# on tensors with antialias disabled.  (Identical to antialias=True for the
# shipped 16->32 upscale; downscaling configs would diverge.)
# ---------------------------------------------------------------------------
def _bilinear_resize_matrix(out_size: int, in_size: int) -> jnp.ndarray:
    o = jnp.arange(out_size, dtype=jnp.float32)
    scale = in_size / out_size
    src = (o + 0.5) * scale - 0.5
    src = jnp.clip(src, 0.0, in_size - 1.0)
    i0 = jnp.floor(src)
    frac = src - i0
    i0c = jnp.clip(i0, 0, in_size - 1).astype(jnp.int32)
    i1c = jnp.clip(i0 + 1, 0, in_size - 1).astype(jnp.int32)
    m = (jax.nn.one_hot(i0c, in_size, dtype=jnp.float32) * (1.0 - frac)[:, None]
         + jax.nn.one_hot(i1c, in_size, dtype=jnp.float32) * frac[:, None])
    return m  # (out_size, in_size)


def _round_up(x: int, m: int) -> int:
    return ((x + m - 1) // m) * m


def _choose_planes_per_step(n_planes: int) -> int:
    """Planes per grid step.

    One grid step keeps full MXU M-occupancy and zero per-step pipeline
    overhead for anything up to 512 planes (x block 512x256 f32 = 512 KiB,
    out block 512x576 f32 = 1.1 MiB; double-buffered this fits every
    generation with huge headroom).  Only for larger batches do we tile at
    256 planes/step so the parallel grid axis has >= 2 steps to shard across
    v7x's two TensorCores.
    """
    if n_planes <= 512:
        return _round_up(n_planes, 8)          # single step, sublane-aligned
    return 256


# ---------------------------------------------------------------------------
# Pallas kernel: one fused matmul (resize+crop) + per-plane affine (normalize).
# ---------------------------------------------------------------------------
def _transforms_kernel(k_ref, sb_ref, x_ref, out_ref):
    # x_ref : (P, H*W)    f32   plane block
    # k_ref : (H*W, HC*WC) bf16 grid-invariant fused resize+crop matrix
    # sb_ref: (P, 2)      f32   per-plane [1/std, -mean/std]
    k = k_ref[...].astype(jnp.float32)          # HBM/VMEM stay bf16; acc in f32
    y = jnp.dot(x_ref[...], k, preferred_element_type=jnp.float32)
    sb = sb_ref[...]
    out_ref[...] = y * sb[:, 0:1] + sb[:, 1:2]


def torch_transforms_forward(x, *, resize_hw, crop_hw, mean, std):
    """x: (B, C, H, W) float32 NCHW.  Returns (B, C, crop_h, crop_w) float32."""
    B, C, H, W = x.shape
    HR, WR = resize_hw
    HC, WC = crop_hw
    off_h = (HR - HC) // 2
    off_w = (WR - WC) // 2

    # Crop fused directly into the interpolation matrices; combine via kron.
    rh_c = _bilinear_resize_matrix(HR, H)[off_h:off_h + HC]      # (HC, H)
    rw_c = _bilinear_resize_matrix(WR, W)[off_w:off_w + WC]      # (WC, W)
    # vec_row(Rh_c @ X @ Rw_c^T) = vec_row(X) @ kron(Rh_c^T, Rw_c^T)
    kmat = jnp.kron(rh_c.T, rw_c.T).astype(jnp.bfloat16)         # (H*W, HC*WC)

    # Per-plane (plane = b*C + c) normalize constants folded into scale/bias,
    # packed as a single (N, 2) operand -> one tiny DMA per grid step.
    mean = jnp.asarray(mean, dtype=jnp.float32)                  # (C,)
    inv_std = 1.0 / jnp.asarray(std, dtype=jnp.float32)          # (C,)
    scale_pl = jnp.tile(inv_std, B)                              # (N,)
    bias_pl = jnp.tile(-mean * inv_std, B)                       # (N,)
    sb = jnp.stack([scale_pl, bias_pl], axis=1)                  # (N, 2)

    N = B * C
    HW, HCWC = H * W, HC * WC
    P = _choose_planes_per_step(N)
    grid = (pl.cdiv(N, P),)     # ragged final block: Pallas masks edge stores

    x_flat = x.reshape(N, HW)   # free, row-major reshape; no host padding

    cost = pl.CostEstimate(
        flops=2 * N * HW * HCWC,
        transcendentals=0,
        bytes_accessed=(x_flat.size * 4 + kmat.size * 2
                        + sb.size * 4 + N * HCWC * 4),
    )

    out_flat = pl.pallas_call(
        _transforms_kernel,
        out_shape=jax.ShapeDtypeStruct((N, HCWC), jnp.float32),
        grid_spec=pltpu.PrefetchScalarGridSpec(
            num_scalar_prefetch=0,
            grid=grid,
            in_specs=[
                pl.BlockSpec((HW, HCWC), lambda i: (0, 0)),   # K, grid-invariant
                pl.BlockSpec((P, 2), lambda i: (i, 0)),       # [1/std, -mean/std]
                pl.BlockSpec((P, HW), lambda i: (i, 0)),      # plane block
            ],
            out_specs=pl.BlockSpec((P, HCWC), lambda i: (i, 0)),
        ),
        compiler_params=pltpu.CompilerParams(
            dimension_semantics=("parallel",)),
        cost_estimate=cost,
    )(kmat, sb, x_flat)

    return out_flat.reshape(B, C, HC, WC)                        # free reshape


# ---------------------------------------------------------------------------
# Pure-JAX reference for sanity checking (independent formulation).
# ---------------------------------------------------------------------------
def _reference(x, *, resize_hw, crop_hw, mean, std):
    B, C, H, W = x.shape
    HR, WR = resize_hw
    HC, WC = crop_hw
    rh = _bilinear_resize_matrix(HR, H)
    rw = _bilinear_resize_matrix(WR, W)
    y = jnp.einsum('oh,bchw->bcow', rh, x)
    y = jnp.einsum('pw,bchw->bchp', rw, y)
    off_h = (HR - HC) // 2
    off_w = (WR - WC) // 2
    y = y[:, :, off_h:off_h + HC, off_w:off_w + WC]
    mean = jnp.asarray(mean, jnp.float32)[None, :, None, None]
    std = jnp.asarray(std, jnp.float32)[None, :, None, None]
    return (y - mean) / std


if __name__ == "__main__":
    key = jax.random.PRNGKey(0)
    B, C, H, W = 4, 3, 16, 16
    x = jax.random.uniform(key, (B, C, H, W), dtype=jnp.float32)

    resize_hw = (32, 32)
    crop_hw = (24, 24)
    mean = [0.485, 0.456, 0.406]
    std = [0.229, 0.224, 0.225]

    out = torch_transforms_forward(
        x, resize_hw=resize_hw, crop_hw=crop_hw, mean=mean, std=std)
    out = jax.block_until_ready(out)

    ref = _reference(x, resize_hw=resize_hw, crop_hw=crop_hw, mean=mean, std=std)
    assert out.shape == (B, C, crop_hw[0], crop_hw[1]), out.shape
    # Tolerance loosened slightly for the bf16-stored kron matrix (the shipped
    # 16->32 weights happen to be exact in bf16, but keep margin).
    assert jnp.allclose(out, ref, atol=2e-3, rtol=2e-3), "mismatch vs reference"

    print("KERNEL_OK")
</pallas_src>

<mosaic_0001>
module attributes {stable_mosaic.version = 11 : i64} {
  func.func @_transforms_kernel(%arg0: i32, %arg1: memref<256x576xbf16, #tpu.memory_space<vmem>>, %arg2: memref<16x2xf32, #tpu.memory_space<vmem>>, %arg3: memref<16x256xf32, #tpu.memory_space<vmem>>, %arg4: memref<16x576xf32, #tpu.memory_space<vmem>>) attributes {dimension_semantics = [#tpu.dimension_semantics<parallel>], iteration_bounds = array<i64: 1>, scalar_prefetch = 0 : i64, scratch_operands = 0 : i64, tpu.core_type = #tpu.core_type<tc>, window_params = [{pipeline_mode = #tpu.pipeline_mode<synchronous>, transform_indices = @transform_0, window_bounds = array<i64: 256, 576>}, {transform_indices = @transform_1, window_bounds = array<i64: 16, 2>}, {transform_indices = @transform_2, window_bounds = array<i64: 16, 256>}, {transform_indices = @transform_3, window_bounds = array<i64: 16, 576>}]} {
    %c0 = arith.constant 0 : index
    %c0_0 = arith.constant 0 : index
    %0 = vector.load %arg1[%c0, %c0_0] : memref<256x576xbf16, #tpu.memory_space<vmem>>, vector<256x576xbf16>
    %1 = arith.extf %0 : vector<256x576xbf16> to vector<256x576xf32>
    %c0_1 = arith.constant 0 : index
    %c0_2 = arith.constant 0 : index
    %2 = vector.load %arg3[%c0_1, %c0_2] : memref<16x256xf32, #tpu.memory_space<vmem>>, vector<16x256xf32>
    %cst = arith.constant dense<0.000000e+00> : vector<16x576xf32>
    %3 = tpu.matmul %2, %1, %cst {dimension_numbers = #tpu.dot_dimension_numbers<[1], [0], [0], [1], [0, 0, 1, 1], [], []>} : vector<16x256xf32>, vector<256x576xf32>, vector<16x576xf32> -> vector<16x576xf32>
    %c0_3 = arith.constant 0 : index
    %c0_4 = arith.constant 0 : index
    %4 = vector.load %arg2[%c0_3, %c0_4] : memref<16x2xf32, #tpu.memory_space<vmem>>, vector<16x2xf32>
    %5 = vector.extract_strided_slice %4 {offsets = [0, 0], sizes = [16, 1], strides = [1, 1]} : vector<16x2xf32> to vector<16x1xf32>
    %6 = vector.broadcast %5 : vector<16x1xf32> to vector<16x576xf32>
    %7 = arith.mulf %3, %6 : vector<16x576xf32>
    %8 = vector.extract_strided_slice %4 {offsets = [0, 1], sizes = [16, 1], strides = [1, 1]} : vector<16x2xf32> to vector<16x1xf32>
    %9 = vector.broadcast %8 : vector<16x1xf32> to vector<16x576xf32>
    %10 = arith.addf %7, %9 : vector<16x576xf32>
    %c0_5 = arith.constant 0 : index
    %c0_6 = arith.constant 0 : index
    %11 = vector.load %arg4[%c0_5, %c0_6] : memref<16x576xf32, #tpu.memory_space<vmem>>, vector<16x576xf32>
    tpu.vector_store %arg4[%c0_5, %c0_6], %10 {strides = array<i32>} : memref<16x576xf32, #tpu.memory_space<vmem>>, vector<16x576xf32>,
    return
  }
  func.func @transform_0(%arg0: i32) -> (i32, i32) {
    %c0_i32 = arith.constant 0 : i32
    %c0_i32_0 = arith.constant 0 : i32
    %c0_i32_1 = arith.constant 0 : i32
    return %c0_i32, %c0_i32_0 : i32, i32
  }
  func.func @transform_1(%arg0: i32) -> (i32, i32) {
    %c0_i32 = arith.constant 0 : i32
    %c0_i32_0 = arith.constant 0 : i32
    return %arg0, %c0_i32 : i32, i32
  }
  func.func @transform_2(%arg0: i32) -> (i32, i32) {
    %c0_i32 = arith.constant 0 : i32
    %c0_i32_0 = arith.constant 0 : i32
    return %arg0, %c0_i32 : i32, i32
  }
  func.func @transform_3(%arg0: i32) -> (i32, i32) {
    %c0_i32 = arith.constant 0 : i32
    %c0_i32_0 = arith.constant 0 : i32
    return %arg0, %c0_i32 : i32, i32
  }
}

</mosaic_0001>

<bundles_post_ra>
// kernel: tpu_custom_call.1
= control target key start
LH: loop header
LB: loop body
LE: loop exit
PB: predicated region body
PF: predicated region fallthrough
CT: control target
= control target key end

     0   :  { %s1002_s0 = inlined_call_operand.vmem [shape: bf16[256,576], index: 0, kind: input, shape index: {}]   ;;  %s1003_s1 = inlined_call_operand.vmem [shape: f32[12,2], index: 1, kind: input, shape index: {}]   ;;  %s1004_s2 = inlined_call_operand.vmem [shape: f32[12,256], index: 2, kind: input, shape index: {}]   ;;  %s1005_s3 = inlined_call_operand.hbm [shape: f32[12,576], index: 3, kind: output, shape index: {}]  }
   0x1   :  { %v60_v0 = vld [vmem:[%s1002_s0 + $0x12c] sm:$0xff]  ;;  %v57_v2 = vld [vmem:[%s1002_s0 + $0x118] sm:$0xff]  ;;  %v54_v8 = vld [vmem:[%s1002_s0 + $0x104] sm:$0xff] }
   0x2   :  { %v108_v1 = vld [vmem:[%s1002_s0 + $0x26c] sm:$0xff]  ;;  %v186_v3 = vunpack.c.l.bf16 %v60_v0  ;;  %v187_v5 = vunpack.c.h.bf16 %v60_v0  ;;  %v105_v7 = vld [vmem:[%s1002_s0 + $0x258] sm:$0xff]  ;;  %v102_v9 = vld [vmem:[%s1002_s0 + $0x244] sm:$0xff]  ;;  %v181_v10 = vunpack.c.l.bf16 %v57_v2  ;;  %v182_v12 = vunpack.c.h.bf16 %v57_v2 }
   0x3   :  { %v266_v4 = vunpack.c.l.bf16 %v108_v1  ;;  %v267_v6 = vunpack.c.h.bf16 %v108_v1  ;;  %v261_v11 = vunpack.c.l.bf16 %v105_v7  ;;  %v262_v13 = vunpack.c.h.bf16 %v105_v7  ;;  %v51_v14 = vld [vmem:[%s1002_s0 + $0xf0] sm:$0xff]  ;;  %v48_v20 = vld [vmem:[%s1002_s0 + $0xdc] sm:$0xff]  ;;  %v45_v26 = vld [vmem:[%s1002_s0 + $0xc8] sm:$0xff] }
   0x4   :  { %v99_v15 = vld [vmem:[%s1002_s0 + $0x230] sm:$0xff]  ;;  %275 = vmatpush.msra.mxu0 %v186_v3  ;;  %v176_v16 = vunpack.c.l.bf16 %v54_v8  ;;  %v256_v17 = vunpack.c.l.bf16 %v102_v9  ;;  %321 = vmatpush.msra.mxu2 %v187_v5  ;;  %v177_v18 = vunpack.c.h.bf16 %v54_v8  ;;  %v257_v19 = vunpack.c.h.bf16 %v102_v9  ;;  %v96_v21 = vld [vmem:[%s1002_s0 + $0x21c] sm:$0xff]  ;;  %v93_v27 = vld [vmem:[%s1002_s0 + $0x208] sm:$0xff] }
   0x5   :  { %298 = vmatpush.msra.mxu1 %v266_v4  ;;  %344 = vmatpush.msra.mxu3 %v267_v6  ;;  %v171_v22 = vunpack.c.l.bf16 %v51_v14  ;;  %v251_v23 = vunpack.c.l.bf16 %v99_v15  ;;  %v172_v24 = vunpack.c.h.bf16 %v51_v14  ;;  %v252_v25 = vunpack.c.h.bf16 %v99_v15  ;;  %v42_v32 = vld [vmem:[%s1002_s0 + $0xb4] sm:$0xff]  ;;  %v39_v38 = vld [vmem:[%s1002_s0 + $0xa0] sm:$0xff]  ;;  %v36_v44 = vld [vmem:[%s1002_s0 + $0x8c] sm:$0xff] }
   0x6   :  { %276 = vmatpush.msra.mxu0 %v181_v10  ;;  %322 = vmatpush.msra.mxu2 %v182_v12  ;;  %v166_v28 = vunpack.c.l.bf16 %v48_v20  ;;  %v246_v29 = vunpack.c.l.bf16 %v96_v21  ;;  %v167_v30 = vunpack.c.h.bf16 %v48_v20  ;;  %v247_v31 = vunpack.c.h.bf16 %v96_v21  ;;  %v90_v33 = vld [vmem:[%s1002_s0 + $0x1f4] sm:$0xff]  ;;  %v87_v39 = vld [vmem:[%s1002_s0 + $0x1e0] sm:$0xff]  ;;  %v84_v45 = vld [vmem:[%s1002_s0 + $0x1cc] sm:$0xff] }
   0x7   :  { %299 = vmatpush.msra.mxu1 %v261_v11  ;;  %345 = vmatpush.msra.mxu3 %v262_v13  ;;  %v161_v34 = vunpack.c.l.bf16 %v45_v26  ;;  %v241_v35 = vunpack.c.l.bf16 %v93_v27  ;;  %v162_v36 = vunpack.c.h.bf16 %v45_v26  ;;  %v242_v37 = vunpack.c.h.bf16 %v93_v27  ;;  %v33_v50 = vld [vmem:[%s1002_s0 + $0x78] sm:$0xff]  ;;  %v30_v56 = vld [vmem:[%s1002_s0 + $0x64] sm:$0xff] }
   0x8   :  { %277 = vmatpush.msra.mxu0 %v176_v16  ;;  %323 = vmatpush.msra.mxu2 %v177_v18  ;;  %v156_v40 = vunpack.c.l.bf16 %v42_v32  ;;  %v236_v41 = vunpack.c.l.bf16 %v90_v33  ;;  %v157_v42 = vunpack.c.h.bf16 %v42_v32  ;;  %v237_v43 = vunpack.c.h.bf16 %v90_v33  ;;  %v81_v51 = vld [vmem:[%s1002_s0 + $0x1b8] sm:$0xff]  ;;  %v78_v57 = vld [vmem:[%s1002_s0 + $0x1a4] sm:$0xff] }
   0x9   :  { %300 = vmatpush.msra.mxu1 %v256_v17  ;;  %346 = vmatpush.msra.mxu3 %v257_v19  ;;  %v151_v46 = vunpack.c.l.bf16 %v39_v38  ;;  %v231_v47 = vunpack.c.l.bf16 %v87_v39  ;;  %v152_v48 = vunpack.c.h.bf16 %v39_v38  ;;  %v232_v49 = vunpack.c.h.bf16 %v87_v39 }
   0xa   :  { %278 = vmatpush.msra.mxu0 %v171_v22  ;;  %324 = vmatpush.msra.mxu2 %v172_v24  ;;  %v146_v52 = vunpack.c.l.bf16 %v36_v44  ;;  %v226_v53 = vunpack.c.l.bf16 %v84_v45  ;;  %v147_v54 = vunpack.c.h.bf16 %v36_v44  ;;  %v227_v55 = vunpack.c.h.bf16 %v84_v45 }
   0xb   :  { %301 = vmatpush.msra.mxu1 %v251_v23  ;;  %347 = vmatpush.msra.mxu3 %v252_v25 }
   0xc   :  { %279 = vmatpush.msra.mxu0 %v166_v28  ;;  %325 = vmatpush.msra.mxu2 %v167_v30 }
   0xd   :  { %302 = vmatpush.msra.mxu1 %v246_v29  ;;  %348 = vmatpush.msra.mxu3 %v247_v31 }
   0xe   :  { %280 = vmatpush.msra.mxu0 %v161_v34  ;;  %326 = vmatpush.msra.mxu2 %v162_v36 }
   0xf   :  { %303 = vmatpush.msra.mxu1 %v241_v35  ;;  %349 = vmatpush.msra.mxu3 %v242_v37 }
  0x10   :  { %281 = vmatpush.msra.mxu0 %v156_v40  ;;  %327 = vmatpush.msra.mxu2 %v157_v42 }
  0x11   :  { %304 = vmatpush.msra.mxu1 %v236_v41  ;;  %350 = vmatpush.msra.mxu3 %v237_v43 }
  0x12   :  { %8 = vsyncpa [#allocation3], 0  ;;  %282 = vmatpush.msra.mxu0 %v151_v46  ;;  %v141_v58 = vunpack.c.l.bf16 %v33_v50  ;;  %v221_v59 = vunpack.c.l.bf16 %v81_v51  ;;  %328 = vmatpush.msra.mxu2 %v152_v48  ;;  %v142_v60 = vunpack.c.h.bf16 %v33_v50  ;;  %v222_v61 = vunpack.c.h.bf16 %v81_v51  ;;  %v27_v62 = vld [vmem:[%s1002_s0 + $0x50] sm:$0xff]  ;;  %v24_v4 = vld [vmem:[%s1002_s0 + $0x3c] sm:$0xff]  ;;  %s562_s27 = sshll.u32 %s1005_s3, 4  ;;  %s643_s28 = smov 640   ;;  %s563_s27 = int_to_ptr.hbm [resolvable:$true] %s562_s27 }
  0x13   :  { %305 = vmatpush.msra.mxu1 %v231_v47  ;;  %351 = vmatpush.msra.mxu3 %v232_v49  ;;  %v75_v63 = vld [vmem:[%s1002_s0 + $0x190] sm:$0xff]  ;;  %v136_v0 = vunpack.c.l.bf16 %v30_v56  ;;  %v216_v1 = vunpack.c.l.bf16 %v78_v57  ;;  %v137_v2 = vunpack.c.h.bf16 %v30_v56  ;;  %v217_v3 = vunpack.c.h.bf16 %v78_v57  ;;  %v72_v5 = vld [vmem:[%s1002_s0 + $0x17c] sm:$0xff]  ;;  %v21_v10 = vld [vmem:[%s1002_s0 + $0x28] sm:$0xff]  ;;  %s644_s29 = smov 40  }
  0x14   :  { %283 = vmatpush.msra.mxu0 %v146_v52  ;;  %329 = vmatpush.msra.mxu2 %v147_v54  ;;  %v131_v6 = vunpack.c.l.bf16 %v27_v62  ;;  %v211_v7 = vunpack.c.l.bf16 %v75_v63  ;;  %v132_v8 = vunpack.c.h.bf16 %v27_v62  ;;  %v212_v9 = vunpack.c.h.bf16 %v75_v63  ;;  %v69_v11 = vld [vmem:[%s1002_s0 + $0x168] sm:$0xff]  ;;  %v18_v16 = vld [vmem:[%s1002_s0 + $0x14] sm:$0xff]  ;;  %v15_v22 = vld [vmem:[%s1002_s0] sm:$0xff] }
  0x15   :  { %306 = vmatpush.msra.mxu1 %v226_v53  ;;  %352 = vmatpush.msra.mxu3 %v227_v55  ;;  %v126_v12 = vunpack.c.l.bf16 %v24_v4  ;;  %v206_v13 = vunpack.c.l.bf16 %v72_v5  ;;  %v127_v14 = vunpack.c.h.bf16 %v24_v4  ;;  %v207_v15 = vunpack.c.h.bf16 %v72_v5  ;;  %v66_v17 = vld [vmem:[%s1002_s0 + $0x154] sm:$0xff]  ;;  %v63_v23 = vld [vmem:[%s1002_s0 + $0x140] sm:$0xff]  ;;  %v55_v40 = vld [vmem:[%s1002_s0 + $0x10c] sm:$0xff] }
  0x16   :  { %284 = vmatpush.msra.mxu0 %v141_v58  ;;  %330 = vmatpush.msra.mxu2 %v142_v60  ;;  %v121_v18 = vunpack.c.l.bf16 %v21_v10  ;;  %v201_v19 = vunpack.c.l.bf16 %v69_v11  ;;  %v122_v20 = vunpack.c.h.bf16 %v21_v10  ;;  %v202_v21 = vunpack.c.h.bf16 %v69_v11  ;;  %v61_v28 = vld [vmem:[%s1002_s0 + $0x134] sm:$0xff]  ;;  %v58_v34 = vld [vmem:[%s1002_s0 + $0x120] sm:$0xff]  ;;  %v103_v41 = vld [vmem:[%s1002_s0 + $0x24c] sm:$0xff] }
  0x17   :  { %307 = vmatpush.msra.mxu1 %v221_v59  ;;  %353 = vmatpush.msra.mxu3 %v222_v61  ;;  %v116_v24 = vunpack.c.l.bf16 %v18_v16  ;;  %v196_v25 = vunpack.c.l.bf16 %v66_v17  ;;  %v117_v26 = vunpack.c.h.bf16 %v18_v16  ;;  %v197_v27 = vunpack.c.h.bf16 %v66_v17  ;;  %v109_v29 = vld [vmem:[%s1002_s0 + $0x274] sm:$0xff]  ;;  %v106_v35 = vld [vmem:[%s1002_s0 + $0x260] sm:$0xff] }
  0x18   :  { %285 = vmatpush.msra.mxu0 %v136_v0  ;;  %331 = vmatpush.msra.mxu2 %v137_v2  ;;  %v111_v30 = vunpack.c.l.bf16 %v15_v22  ;;  %v191_v31 = vunpack.c.l.bf16 %v63_v23  ;;  %v112_v32 = vunpack.c.h.bf16 %v15_v22  ;;  %v192_v33 = vunpack.c.h.bf16 %v63_v23  ;;  %v52_v46 = vld [vmem:[%s1002_s0 + $0xf8] sm:$0xff]  ;;  %v49_v52 = vld [vmem:[%s1002_s0 + $0xe4] sm:$0xff]  ;;  %v46_v58 = vld [vmem:[%s1002_s0 + $0xd0] sm:$0xff] }
  0x19   :  { %308 = vmatpush.msra.mxu1 %v216_v1  ;;  %354 = vmatpush.msra.mxu3 %v217_v3  ;;  %v188_v36 = vunpack.c.l.bf16 %v61_v28  ;;  %v268_v37 = vunpack.c.l.bf16 %v109_v29  ;;  %v189_v38 = vunpack.c.h.bf16 %v61_v28  ;;  %v269_v39 = vunpack.c.h.bf16 %v109_v29  ;;  %v100_v47 = vld [vmem:[%s1002_s0 + $0x238] sm:$0xff]  ;;  %v97_v53 = vld [vmem:[%s1002_s0 + $0x224] sm:$0xff]  ;;  %v94_v59 = vld [vmem:[%s1002_s0 + $0x210] sm:$0xff] }
  0x1a   :  { %286 = vmatpush.msra.mxu0 %v131_v6  ;;  %332 = vmatpush.msra.mxu2 %v132_v8  ;;  %v183_v42 = vunpack.c.l.bf16 %v58_v34  ;;  %v263_v43 = vunpack.c.l.bf16 %v106_v35  ;;  %v184_v44 = vunpack.c.h.bf16 %v58_v34  ;;  %v264_v45 = vunpack.c.h.bf16 %v106_v35  ;;  %v43_v0 = vld [vmem:[%s1002_s0 + $0xbc] sm:$0xff]  ;;  %v40_v6 = vld [vmem:[%s1002_s0 + $0xa8] sm:$0xff] }
  0x1b   :  { %309 = vmatpush.msra.mxu1 %v211_v7  ;;  %355 = vmatpush.msra.mxu3 %v212_v9  ;;  %v178_v48 = vunpack.c.l.bf16 %v55_v40  ;;  %v258_v49 = vunpack.c.l.bf16 %v103_v41  ;;  %v179_v50 = vunpack.c.h.bf16 %v55_v40  ;;  %v259_v51 = vunpack.c.h.bf16 %v103_v41  ;;  %v91_v1 = vld [vmem:[%s1002_s0 + $0x1fc] sm:$0xff]  ;;  %v88_v7 = vld [vmem:[%s1002_s0 + $0x1e8] sm:$0xff] }
  0x1c   :  { %287 = vmatpush.msra.mxu0 %v126_v12  ;;  %333 = vmatpush.msra.mxu2 %v127_v14  ;;  %v173_v54 = vunpack.c.l.bf16 %v52_v46  ;;  %v253_v55 = vunpack.c.l.bf16 %v100_v47  ;;  %v174_v56 = vunpack.c.h.bf16 %v52_v46  ;;  %v254_v57 = vunpack.c.h.bf16 %v100_v47  ;;  %v37_v12 = vld [vmem:[%s1002_s0 + $0x94] sm:$0xff] }
  0x1d   :  { %310 = vmatpush.msra.mxu1 %v206_v13  ;;  %356 = vmatpush.msra.mxu3 %v207_v15  ;;  %v168_v60 = vunpack.c.l.bf16 %v49_v52  ;;  %v248_v61 = vunpack.c.l.bf16 %v97_v53  ;;  %v169_v62 = vunpack.c.h.bf16 %v49_v52  ;;  %v249_v63 = vunpack.c.h.bf16 %v97_v53  ;;  %v85_v13 = vld [vmem:[%s1002_s0 + $0x1d4] sm:$0xff] }
  0x1e   :  { %288 = vmatpush.msra.mxu0 %v121_v18  ;;  %334 = vmatpush.msra.mxu2 %v122_v20  ;;  %v163_v2 = vunpack.c.l.bf16 %v46_v58  ;;  %v243_v3 = vunpack.c.l.bf16 %v94_v59  ;;  %v164_v4 = vunpack.c.h.bf16 %v46_v58  ;;  %v244_v5 = vunpack.c.h.bf16 %v94_v59  ;;  %v34_v18 = vld [vmem:[%s1002_s0 + $0x80] sm:$0xff]  ;;  %v16_v58 = vld [vmem:[%s1002_s0 + $0x8] sm:$0xff] }
  0x1f   :  { %311 = vmatpush.msra.mxu1 %v201_v19  ;;  %357 = vmatpush.msra.mxu3 %v202_v21  ;;  %v158_v8 = vunpack.c.l.bf16 %v43_v0  ;;  %v238_v9 = vunpack.c.l.bf16 %v91_v1  ;;  %v159_v10 = vunpack.c.h.bf16 %v43_v0  ;;  %v239_v11 = vunpack.c.h.bf16 %v91_v1  ;;  %v82_v19 = vld [vmem:[%s1002_s0 + $0x1c0] sm:$0xff]  ;;  %v64_v59 = vld [vmem:[%s1002_s0 + $0x148] sm:$0xff]  ;;  %v110_v1 = vld [vmem:[%s1002_s0 + $0x27c] sm:$0xf] }
  0x20   :  { %289 = vmatpush.msra.mxu0 %v116_v24  ;;  %335 = vmatpush.msra.mxu2 %v117_v26  ;;  %v153_v14 = vunpack.c.l.bf16 %v40_v6  ;;  %v233_v15 = vunpack.c.l.bf16 %v88_v7  ;;  %v154_v16 = vunpack.c.h.bf16 %v40_v6  ;;  %v234_v17 = vunpack.c.h.bf16 %v88_v7  ;;  %v31_v24 = vld [vmem:[%s1002_s0 + $0x6c] sm:$0xff]  ;;  %v107_v6 = vld [vmem:[%s1002_s0 + $0x268] sm:$0xf] }
  0x21   :  { %312 = vmatpush.msra.mxu1 %v196_v25  ;;  %358 = vmatpush.msra.mxu3 %v197_v27  ;;  %v148_v20 = vunpack.c.l.bf16 %v37_v12  ;;  %v228_v21 = vunpack.c.l.bf16 %v85_v13  ;;  %v149_v22 = vunpack.c.h.bf16 %v37_v12  ;;  %v229_v23 = vunpack.c.h.bf16 %v85_v13  ;;  %v79_v25 = vld [vmem:[%s1002_s0 + $0x1ac] sm:$0xff]  ;;  %v53_v12 = vld [vmem:[%s1002_s0 + $0x100] sm:$0xf] }
  0x22   :  { %290 = vmatpush.msra.mxu0 %v111_v30  ;;  %336 = vmatpush.msra.mxu2 %v112_v32  ;;  %v143_v26 = vunpack.c.l.bf16 %v34_v18  ;;  %v223_v27 = vunpack.c.l.bf16 %v82_v19  ;;  %v144_v28 = vunpack.c.h.bf16 %v34_v18  ;;  %v224_v29 = vunpack.c.h.bf16 %v82_v19  ;;  %v28_v30 = vld [vmem:[%s1002_s0 + $0x58] sm:$0xff]  ;;  %v50_v18 = vld [vmem:[%s1002_s0 + $0xec] sm:$0xf] }
  0x23   :  { %313 = vmatpush.msra.mxu1 %v191_v31  ;;  %359 = vmatpush.msra.mxu3 %v192_v33  ;;  %v76_v31 = vld [vmem:[%s1002_s0 + $0x198] sm:$0xff]  ;;  %v138_v32 = vunpack.c.l.bf16 %v31_v24  ;;  %v218_v33 = vunpack.c.l.bf16 %v79_v25  ;;  %v139_v34 = vunpack.c.h.bf16 %v31_v24  ;;  %v219_v35 = vunpack.c.h.bf16 %v79_v25  ;;  %v98_v19 = vld [vmem:[%s1002_s0 + $0x22c] sm:$0xf] }
  0x24   :  { %367 = vmatpush.msrb.mxu0 %v188_v36  ;;  %413 = vmatpush.msrb.mxu2 %v189_v38  ;;  %v25_v36 = vld [vmem:[%s1002_s0 + $0x44] sm:$0xff]  ;;  %v133_v38 = vunpack.c.l.bf16 %v28_v30  ;;  %v134_v40 = vunpack.c.h.bf16 %v28_v30  ;;  %v214_v41 = vunpack.c.h.bf16 %v76_v31  ;;  %v193_v0 = vunpack.c.l.bf16 %v64_v59  ;;  %v95_v24 = vld [vmem:[%s1002_s0 + $0x218] sm:$0xf]  ;;  %v41_v30 = vld [vmem:[%s1002_s0 + $0xb0] sm:$0xf] }
  0x25   :  { %390 = vmatpush.msrb.mxu1 %v268_v37  ;;  %436 = vmatpush.msrb.mxu3 %v269_v39  ;;  %v73_v37 = vld [vmem:[%s1002_s0 + $0x184] sm:$0xff]  ;;  %v213_v39 = vunpack.c.l.bf16 %v76_v31  ;;  %v129_v46 = vunpack.c.h.bf16 %v25_v36  ;;  %v270_v7 = vunpack.c.l.bf16 %v110_v1  ;;  %v250_v25 = vunpack.c.l.bf16 %v98_v19 }
  0x26   :  { %368 = vmatpush.msrb.mxu0 %v183_v42  ;;  %414 = vmatpush.msrb.mxu2 %v184_v44  ;;  %v22_v42 = vld [vmem:[%s1002_s0 + $0x30] sm:$0xff]  ;;  %v128_v44 = vunpack.c.l.bf16 %v25_v36  ;;  %v209_v47 = vunpack.c.h.bf16 %v73_v37  ;;  %v38_v36 = vld [vmem:[%s1002_s0 + $0x9c] sm:$0xf]  ;;  %v506_v1 = vld [vmem:[%s1003_s1 + $0x8] sm:$0xff]  ;;  %vm549_vm0 = vcmask 523264  }
  0x27   :  { %391 = vmatpush.msrb.mxu1 %v263_v43  ;;  %437 = vmatpush.msrb.mxu3 %v264_v45  ;;  %v70_v43 = vld [vmem:[%s1002_s0 + $0x170] sm:$0xff]  ;;  %v208_v45 = vunpack.c.l.bf16 %v73_v37  ;;  %v124_v52 = vunpack.c.h.bf16 %v22_v42  ;;  %v86_v37 = vld [vmem:[%s1002_s0 + $0x1dc] sm:$0xf] }
  0x28   :  { %369 = vmatpush.msrb.mxu0 %v178_v48  ;;  %415 = vmatpush.msrb.mxu2 %v179_v50  ;;  %v19_v48 = vld [vmem:[%s1002_s0 + $0x1c] sm:$0xff]  ;;  %v123_v50 = vunpack.c.l.bf16 %v22_v42  ;;  %v204_v53 = vunpack.c.h.bf16 %v70_v43 }
  0x29   :  { %392 = vmatpush.msrb.mxu1 %v258_v49  ;;  %438 = vmatpush.msrb.mxu3 %v259_v51  ;;  %v67_v49 = vld [vmem:[%s1002_s0 + $0x15c] sm:$0xff]  ;;  %v203_v51 = vunpack.c.l.bf16 %v70_v43  ;;  %v32_v43 = vld [vmem:[%s1002_s0 + $0x74] sm:$0xf] }
  0x2a   :  { %370 = vmatpush.msrb.mxu0 %v173_v54  ;;  %416 = vmatpush.msrb.mxu2 %v174_v56  ;;  %v118_v54 = vunpack.c.l.bf16 %v19_v48  ;;  %v119_v56 = vunpack.c.h.bf16 %v19_v48  ;;  %v29_v48 = vld [vmem:[%s1002_s0 + $0x60] sm:$0xf] }
  0x2b   :  { %393 = vmatpush.msrb.mxu1 %v253_v55  ;;  %439 = vmatpush.msrb.mxu3 %v254_v57  ;;  %v198_v55 = vunpack.c.l.bf16 %v67_v49  ;;  %v199_v57 = vunpack.c.h.bf16 %v67_v49  ;;  %v640_v49 = vmov 0  }
  0x2c   :  { %371 = vmatpush.msrb.mxu0 %v168_v60  ;;  %417 = vmatpush.msrb.mxu2 %v169_v62  ;;  %v860_v60 = vld [vmem:[%s1004_s2] sm:$0xff]  ;;  %v62_v62 = vld [vmem:[%s1002_s0 + $0x13c] sm:$0xf] }
  0x2d   :  { %394 = vmatpush.msrb.mxu1 %v248_v61  ;;  %440 = vmatpush.msrb.mxu3 %v249_v63  ;;  %v865_v61 = vld [vmem:[%s1004_s2 + $0x8] sm:$0xff]  ;;  %v113_v63 = vunpack.c.l.bf16 %v16_v58 }
  0x2e   :  { %372 = vmatpush.msrb.mxu0 %v163_v2  ;;  %418 = vmatpush.msrb.mxu2 %v164_v4  ;;  %v114_v2 = vunpack.c.h.bf16 %v16_v58  ;;  %v59_v4 = vld [vmem:[%s1002_s0 + $0x128] sm:$0xf] }
  0x2f   :  { %395 = vmatpush.msrb.mxu1 %v243_v3  ;;  %441 = vmatpush.msrb.mxu3 %v244_v5  ;;  %v194_v3 = vunpack.c.h.bf16 %v64_v59  ;;  %v190_v5 = vunpack.c.l.bf16 %v62_v62  ;;  %v71_v59 = vld [vmem:[%s1002_s0 + $0x178] sm:$0xf] }
  0x30   :  { %373 = vmatpush.msrb.mxu0 %v158_v8  ;;  %419 = vmatpush.msrb.mxu2 %v159_v10  ;;  %v56_v8 = vld [vmem:[%s1002_s0 + $0x114] sm:$0xf] }
  0x31   :  { %396 = vmatpush.msrb.mxu1 %v238_v9  ;;  %442 = vmatpush.msrb.mxu3 %v239_v11  ;;  %v185_v9 = vunpack.c.l.bf16 %v59_v4  ;;  %v104_v10 = vld [vmem:[%s1002_s0 + $0x254] sm:$0xf]  ;;  %v265_v11 = vunpack.c.l.bf16 %v107_v6  ;;  %v180_v13 = vunpack.c.l.bf16 %v56_v8  ;;  %v17_v4 = vld [vmem:[%s1002_s0 + $0x10] sm:$0xf] }
  0x32   :  { %374 = vmatpush.msrb.mxu0 %v153_v14  ;;  %420 = vmatpush.msrb.mxu2 %v154_v16  ;;  %v101_v14 = vld [vmem:[%s1002_s0 + $0x240] sm:$0xf]  ;;  %v175_v16 = vunpack.c.l.bf16 %v53_v12  ;;  %v65_v6 = vld [vmem:[%s1002_s0 + $0x150] sm:$0xf]  ;;  %v115_v8 = vunpack.c.l.bf16 %v17_v4 }
  0x33   :  { %397 = vmatpush.msrb.mxu1 %v233_v15  ;;  %443 = vmatpush.msrb.mxu3 %v234_v17  ;;  %v260_v15 = vunpack.c.l.bf16 %v104_v10  ;;  %v255_v17 = vunpack.c.l.bf16 %v101_v14 }
  0x34   :  { %375 = vmatpush.msrb.mxu0 %v148_v20  ;;  %421 = vmatpush.msrb.mxu2 %v149_v22  ;;  %v904_v20 = vld [vmem:[%s1004_s2 + $0x10] sm:$0xff]  ;;  %v47_v22 = vld [vmem:[%s1002_s0 + $0xd8] sm:$0xf] }
  0x35   :  { %398 = vmatpush.msrb.mxu1 %v228_v21  ;;  %444 = vmatpush.msrb.mxu3 %v229_v23  ;;  %v909_v21 = vld [vmem:[%s1004_s2 + $0x18] sm:$0xff]  ;;  %v170_v23 = vunpack.c.l.bf16 %v50_v18 }
  0x36   :  { %376 = vmatpush.msrb.mxu0 %v143_v26  ;;  %422 = vmatpush.msrb.mxu2 %v144_v28  ;;  %v44_v26 = vld [vmem:[%s1002_s0 + $0xc4] sm:$0xf] }
  0x37   :  { %399 = vmatpush.msrb.mxu1 %v223_v27  ;;  %445 = vmatpush.msrb.mxu3 %v224_v29  ;;  %v165_v27 = vunpack.c.l.bf16 %v47_v22  ;;  %v92_v28 = vld [vmem:[%s1002_s0 + $0x204] sm:$0xf]  ;;  %v245_v29 = vunpack.c.l.bf16 %v95_v24  ;;  %v160_v31 = vunpack.c.l.bf16 %v44_v26 }
  0x38   :  { %377 = vmatpush.msrb.mxu0 %v138_v32  ;;  %423 = vmatpush.msrb.mxu2 %v139_v34  ;;  %v89_v32 = vld [vmem:[%s1002_s0 + $0x1f0] sm:$0xf]  ;;  %v155_v34 = vunpack.c.l.bf16 %v41_v30 }
  0x39   :  { %400 = vmatpush.msrb.mxu1 %v218_v33  ;;  %446 = vmatpush.msrb.mxu3 %v219_v35  ;;  %v240_v33 = vunpack.c.l.bf16 %v92_v28  ;;  %v235_v35 = vunpack.c.l.bf16 %v89_v32 }
  0x3a   :  { %378 = vmatpush.msrb.mxu0 %v133_v38  ;;  %424 = vmatpush.msrb.mxu2 %v134_v40  ;;  %v35_v38 = vld [vmem:[%s1002_s0 + $0x88] sm:$0xf]  ;;  %v230_v40 = vunpack.c.l.bf16 %v86_v37 }
  0x3b   :  { %401 = vmatpush.msrb.mxu1 %v213_v39  ;;  %447 = vmatpush.msrb.mxu3 %v214_v41  ;;  %v150_v39 = vunpack.c.l.bf16 %v38_v36  ;;  %v83_v41 = vld [vmem:[%s1002_s0 + $0x1c8] sm:$0xf]  ;;  %v145_v42 = vunpack.c.l.bf16 %v35_v38 }
  0x3c   :  { %379 = vmatpush.msrb.mxu0 %v128_v44  ;;  %425 = vmatpush.msrb.mxu2 %v129_v46  ;;  %v505_v44 = vld [vmem:[%s1003_s1] sm:$0xff]  ;;  %v80_v46 = vld [vmem:[%s1002_s0 + $0x1b4] sm:$0xf] }
  0x3d   :  { %402 = vmatpush.msrb.mxu1 %v208_v45  ;;  %448 = vmatpush.msrb.mxu3 %v209_v47  ;;  %v225_v45 = vunpack.c.l.bf16 %v83_v41  ;;  %v140_v47 = vunpack.c.l.bf16 %v32_v43 }
  0x3e   :  { %380 = vmatpush.msrb.mxu0 %v123_v50  ;;  %426 = vmatpush.msrb.mxu2 %v124_v52  ;;  %v77_v50 = vld [vmem:[%s1002_s0 + $0x1a0] sm:$0xf]  ;;  %v135_v52 = vunpack.c.l.bf16 %v29_v48 }
  0x3f   :  { %403 = vmatpush.msrb.mxu1 %v203_v51  ;;  %449 = vmatpush.msrb.mxu3 %v204_v53  ;;  %v220_v51 = vunpack.c.l.bf16 %v80_v46  ;;  %v641_v53 = vmov 1  }
  0x40   :  { %381 = vmatpush.msrb.mxu0 %v118_v54  ;;  %427 = vmatpush.msrb.mxu2 %v119_v56  ;;  %v215_v54 = vunpack.c.l.bf16 %v77_v50  ;;  %v74_v56 = vld [vmem:[%s1002_s0 + $0x18c] sm:$0xf] }
  0x41   :  { %404 = vmatpush.msrb.mxu1 %v198_v55  ;;  %450 = vmatpush.msrb.mxu3 %v199_v57  ;;  %v26_v55 = vld [vmem:[%s1002_s0 + $0x4c] sm:$0xf]  ;;  %v23_v57 = vld [vmem:[%s1002_s0 + $0x38] sm:$0xf]  ;;  %v210_v62 = vunpack.c.l.bf16 %v74_v56 }
  0x42   :  { %291 = vmatmul.f32.vlgmr.msra.gmra.mxu0 %v860_v60  ;;  %314 = vmatmul.f32.vlgmr.msra.gmra.mxu1 %v865_v61  ;;  %v130_v58 = vunpack.c.l.bf16 %v26_v55 }
  0x43   :  { %337 = vmatmul.f32.vlgmr.msra.gmra.mxu2 %v860_v60  ;;  %360 = vmatmul.f32.vlgmr.msra.gmra.mxu3 %v865_v61 }
  0x44   :  { %382 = vmatpush.msrb.mxu0 %v113_v63  ;;  %405 = vmatpush.msrb.mxu1 %v193_v0  ;;  %v125_v63 = vunpack.c.l.bf16 %v23_v57  ;;  %v20_v0 = vld [vmem:[%s1002_s0 + $0x24] sm:$0xf] }
  0x45   :  { %428 = vmatpush.msrb.mxu2 %v114_v2  ;;  %451 = vmatpush.msrb.mxu3 %v194_v3  ;;  %v205_v2 = vunpack.c.l.bf16 %v71_v59  ;;  %v68_v3 = vld [vmem:[%s1002_s0 + $0x164] sm:$0xf]  ;;  %s642_s0 = smov [#allocation2]  }
  0x46   :  { %459 = vmatpush.msra.mxu0 %v190_v5  ;;  %482 = vmatpush.msra.mxu1 %v270_v7  ;;  %s560_s1 = sshll.u32 %s642_s0, 4  ;;  %s561_s1 = int_to_ptr.vmem [resolvable:$true] %s560_s1 }
  0x47   :  { %574 = vmatpush.msra.mxu2 %v190_v5  ;;  %590 = vmatpush.msra.mxu3 %v270_v7  ;;  %v120_v5 = vunpack.c.l.bf16 %v20_v0  ;;  %v200_v7 = vunpack.c.l.bf16 %v68_v3 }
  0x48   :  { %460 = vmatpush.msra.mxu0 %v185_v9  ;;  %483 = vmatpush.msra.mxu1 %v265_v11 }
  0x49   :  { %575 = vmatpush.msra.mxu2 %v185_v9  ;;  %591 = vmatpush.msra.mxu3 %v265_v11  ;;  %v195_v9 = vunpack.c.l.bf16 %v65_v6 }
  0x4a   :  { %461 = vmatpush.msra.mxu0 %v180_v13  ;;  %484 = vmatpush.msra.mxu1 %v260_v15 }
  0x4b   :  { %576 = vmatpush.msra.mxu2 %v180_v13  ;;  %592 = vmatpush.msra.mxu3 %v260_v15 }
  0x4c   :  { %462 = vmatpush.msra.mxu0 %v175_v16  ;;  %485 = vmatpush.msra.mxu1 %v255_v17 }
  0x4d   :  { %577 = vmatpush.msra.mxu2 %v175_v16  ;;  %593 = vmatpush.msra.mxu3 %v255_v17 }
  0x4e   :  { %294 = vmatmul.f32.gmra.mxu0 %v904_v20  ;;  %317 = vmatmul.f32.gmra.mxu1 %v909_v21 }
  0x4f   :  { %340 = vmatmul.f32.gmra.mxu2 %v904_v20  ;;  %363 = vmatmul.f32.gmra.mxu3 %v909_v21 }
  0x50   :  { %463 = vmatpush.msra.mxu0 %v170_v23  ;;  %578 = vmatpush.msra.mxu2 %v170_v23 }
  0x51   :  { %486 = vmatpush.msra.mxu1 %v250_v25  ;;  %594 = vmatpush.msra.mxu3 %v250_v25 }
  0x52   :  { %464 = vmatpush.msra.mxu0 %v165_v27  ;;  %579 = vmatpush.msra.mxu2 %v165_v27 }
  0x53   :  { %487 = vmatpush.msra.mxu1 %v245_v29  ;;  %595 = vmatpush.msra.mxu3 %v245_v29 }
  0x54   :  { %465 = vmatpush.msra.mxu0 %v160_v31  ;;  %580 = vmatpush.msra.mxu2 %v160_v31 }
  0x55   :  { %488 = vmatpush.msra.mxu1 %v240_v33  ;;  %596 = vmatpush.msra.mxu3 %v240_v33 }
  0x56   :  { %466 = vmatpush.msra.mxu0 %v155_v34  ;;  %581 = vmatpush.msra.mxu2 %v155_v34 }
  0x57   :  { %489 = vmatpush.msra.mxu1 %v235_v35  ;;  %597 = vmatpush.msra.mxu3 %v235_v35 }
  0x58   :  { %383 = vmatmul.f32.vlgmr.msrb.gmra.mxu0 %v860_v60  ;;  %406 = vmatmul.f32.vlgmr.msrb.gmra.mxu1 %v865_v61 }
  0x59   :  { %429 = vmatmul.f32.vlgmr.msrb.gmra.mxu2 %v860_v60  ;;  %452 = vmatmul.f32.vlgmr.msrb.gmra.mxu3 %v865_v61 }
  0x5a   :  { %467 = vmatpush.msra.mxu0 %v150_v39  ;;  %582 = vmatpush.msra.mxu2 %v150_v39 }
  0x5b   :  { %490 = vmatpush.msra.mxu1 %v230_v40  ;;  %598 = vmatpush.msra.mxu3 %v230_v40 }
  0x5c   :  { %611 = vset.pattern.permute.xlu0 %v640_v49  ;;  %468 = vmatpush.msra.mxu0 %v145_v42 }
  0x5d   :  { %509 = vperm.xlu0 %611, %v505_v44   ;;  %583 = vmatpush.msra.mxu2 %v145_v42 }
  0x5e   :  { %491 = vmatpush.msra.mxu1 %v225_v45  ;;  %599 = vmatpush.msra.mxu3 %v225_v45 }
  0x5f   :  { %612 = vset.pattern.permute.xlu1 %v641_v53  ;;  %469 = vmatpush.msra.mxu0 %v140_v47 }
  0x60   :  { %528 = vperm.xlu1 %612, %v505_v44   ;;  %584 = vmatpush.msra.mxu2 %v140_v47 }
  0x61   :  { %492 = vmatpush.msra.mxu1 %v220_v51  ;;  %600 = vmatpush.msra.mxu3 %v220_v51 }
  0x62   :  { %470 = vmatpush.msra.mxu0 %v135_v52  ;;  %585 = vmatpush.msra.mxu2 %v135_v52 }
  0x63   :  { %493 = vmatpush.msra.mxu1 %v215_v54  ;;  %601 = vmatpush.msra.mxu3 %v215_v54 }
  0x64   :  { %386 = vmatmul.f32.gmra.mxu0 %v904_v20  ;;  %409 = vmatmul.f32.gmra.mxu1 %v909_v21 }
  0x65   :  { %432 = vmatmul.f32.gmra.mxu2 %v904_v20  ;;  %455 = vmatmul.f32.gmra.mxu3 %v909_v21 }
  0x66   :  { %471 = vmatpush.msra.mxu0 %v130_v58  ;;  %586 = vmatpush.msra.mxu2 %v130_v58 }
  0x67   :  { %494 = vmatpush.msra.mxu1 %v210_v62  ;;  %602 = vmatpush.msra.mxu3 %v210_v62 }
  0x68   :  { %514 = vperm.xlu0 %611, %v506_v1   ;;  %472 = vmatpush.msra.mxu0 %v125_v63 }
  0x69   :  { %587 = vmatpush.msra.mxu2 %v125_v63  ;;  %495 = vmatpush.msra.mxu1 %v205_v2 }
  0x6a   :  { %603 = vmatpush.msra.mxu3 %v205_v2  ;;  %532 = vperm.xlu1 %612, %v506_v1  }
  0x6b   :  { %473 = vmatpush.msra.mxu0 %v120_v5  ;;  %588 = vmatpush.msra.mxu2 %v120_v5 }
  0x6c   :  { %496 = vmatpush.msra.mxu1 %v200_v7  ;;  %604 = vmatpush.msra.mxu3 %v200_v7 }
  0x6d   :  { %474 = vmatpush.msra.mxu0 %v115_v8  ;;  %589 = vmatpush.msra.mxu2 %v115_v8 }
  0x6e   :  { %497 = vmatpush.msra.mxu1 %v195_v9  ;;  %605 = vmatpush.msra.mxu3 %v195_v9 }
  0x6f   :  { %475 = vmatmul.f32.vlgmr.msra.gmra.mxu0 %v860_v60  ;;  %478 = vmatmul.f32.vlgmr.msra.gmra.mxu2 %v904_v20 }
  0x70   :  { %498 = vmatmul.f32.vlgmr.msra.gmra.mxu1 %v865_v61  ;;  %501 = vmatmul.f32.vlgmr.msra.gmra.mxu3 %v909_v21 }
  0x71   :  { %613 = vset.pattern.permute.xlu0 %v641_v53 }
  0xbf   :  { %v292_v10 = vpop.f32.mrf.mxu0  ;;  %v315_v11 = vpop.f32.mrf.mxu1 }
  0xc0   :  { %v316_v16 = vadd.f32 %v315_v11, %v292_v10 }
  0xc6   :  { %v338_v12 = vpop.f32.mrf.mxu2  ;;  %v361_v13 = vpop.f32.mrf.mxu3 }
  0xc7   :  { %v362_v17 = vadd.f32 %v361_v13, %v338_v12 }
  0xcb   :  { %v295_v14 = vpop.f32.mrf.mxu0  ;;  %v318_v15 = vpop.f32.mrf.mxu1 }
  0xcc   :  { %v319_v27 = vadd.f32 %v318_v15, %v295_v14 }
  0xcf   :  { %v510_v18 = vpop.permute.xlu0 %509 }
  0xd0   :  { %v517_v19 = vmul.f32 %v510_v18, %v316_v16  ;;  %v518_v22 = vmul.f32 %v510_v18, %v362_v17 }
  0xd2   :  { %v529_v23 = vpop.permute.xlu1 %528  ;;  %v341_v60 = vpop.f32.mrf.mxu2 }
  0xd3   :  { %v535_v24 = vadd.f32 %v529_v23, %v517_v19  ;;  %v536_v20 = vadd.f32 %v529_v23, %v518_v22  ;;  %v364_v25 = vpop.f32.mrf.mxu3 }
  0xd4   :  { %v365_v28 = vadd.f32 %v364_v25, %v341_v60 }
  0xd5   :  { %545 = vst [vmem:[#allocation2] sm:$0xff] %v535_v24  ;;  %v384_v61 = vpop.f32.mrf.mxu0  ;;  %v407_v21 = vpop.f32.mrf.mxu1 }
  0xd6   :  { %546 = vst [vmem:[#allocation2 + $0x8] sm:$0xff] %v536_v20  ;;  %v408_v26 = vadd.f32 %v407_v21, %v384_v61 }
  0xd8   :  { %v519_v29 = vmul.f32 %v510_v18, %v408_v26 }
  0xda   :  { %v515_v30 = vpop.permute.xlu0 %514  ;;  %v537_v31 = vadd.f32 %v529_v23, %v519_v29 }
  0xdb   :  { %v522_v32 = vmul.f32 %v515_v30, %v319_v27  ;;  %v523_v33 = vmul.f32 %v515_v30, %v365_v28 }
  0xdc   :  { %547 = vst [vmem:[#allocation2 + $0x10] sm:$0xff] %v537_v31  ;;  %v533_v34 = vpop.permute.xlu1 %532  ;;  %v430_v35 = vpop.f32.mrf.mxu2 }
  0xdd   :  { %v540_v36 = vadd.f32 %v533_v34, %v522_v32  ;;  %v541_v37 = vadd.f32 %v533_v34, %v523_v33  ;;  %v453_v38 = vpop.f32.mrf.mxu3 }
  0xde   :  { %v454_v39 = vadd.f32 %v453_v38, %v430_v35 }
  0xdf   :  { %551 = vst [vmem:[#allocation2 + $0x28] sm:$0xff] %v540_v36 }
  0xe0   :  { %552 = vst [vmem:[#allocation2 + $0x30] sm:$0xff] %v541_v37  ;;  %v520_v40 = vmul.f32 %v510_v18, %v454_v39 }
  0xe1   :  { %v387_v41 = vpop.f32.mrf.mxu0  ;;  %v410_v42 = vpop.f32.mrf.mxu1 }
  0xe2   :  { %v538_v43 = vadd.f32 %v529_v23, %v520_v40  ;;  %v411_v44 = vadd.f32 %v410_v42, %v387_v41 }
  0xe4   :  { %548 = vst [vmem:[#allocation2 + $0x18] sm:$0xff] %v538_v43  ;;  %v524_v45 = vmul.f32 %v515_v30, %v411_v44 }
  0xe6   :  { %v542_v46 = vadd.f32 %v533_v34, %v524_v45 }
  0xe8   :  { %553 = vst [vmem:[#allocation2 + $0x38] sm:$0xff] %v542_v46  ;;  %v433_v47 = vpop.f32.mrf.mxu2  ;;  %v456_v48 = vpop.f32.mrf.mxu3 }
  0xe9   :  { %v457_v49 = vadd.f32 %v456_v48, %v433_v47 }
  0xeb   :  { %v525_v50 = vmul.f32 %v515_v30, %v457_v49 }
  0xec   :  { %v476_v51 = vpop.f32.mrf.mxu0 }
  0xed   :  { %v543_v52 = vadd.f32 %v533_v34, %v525_v50  ;;  %v499_v53 = vpop.f32.mrf.mxu1 }
  0xee   :  { %v500_v54 = vadd.f32 %v499_v53, %v476_v51 }
  0xef   :  { %554 = vst [vmem:[#allocation2 + $0x40] sm:$0xff] %v543_v52 }
  0xf0   :  { %v521_v55 = vmul.f32 %v510_v18, %v500_v54 }
  0xf2   :  { %v539_v56 = vadd.f32 %v529_v23, %v521_v55  ;;  %v479_v57 = vpop.f32.mrf.mxu2 }
  0xf3   :  { %v502_v58 = vpop.f32.mrf.mxu3 }
  0xf4   :  { %550 = vst.msk [vmem:[#allocation2 + $0x20] sm:$0xff] %vm549_vm0, %v539_v56  ;;  %v503_v59 = vadd.f32 %v502_v58, %v479_v57 }
  0xf6   :  { %v526_v62 = vmul.f32 %v515_v30, %v503_v59 }
  0xf8   :  { %v544_v63 = vadd.f32 %v533_v34, %v526_v62 }
  0xfa   :  { %555 = vst.msk [vmem:[#allocation2 + $0x48] sm:$0xff] %vm549_vm0, %v544_v63 }
  0xfb   :  { %568 = dma.vmem_to_hbm [thread:$0]  %s561_s1, 1280, %s563_s27, [#allocation3], %s643_s28, %s643_s28, %s644_s29  }
  0xfc   :  { %638 = dma.done.wait [#allocation3], 1280  }
  0xfd   :  { %639 = vsyncadd [#allocation3], 4294966016 }
  0xfe   :  { %573 = vsyncpa [#allocation3], 1 }

</bundles_post_ra>
